<compile_context>
chip_gen: v5e
topology: v5e:2x2
jax: 0.10.0
libtpu: 0.0.40
codegen_flags: <defaults>
</compile_context>

<pallas_src>
import functools

import jax
import jax.numpy as jnp
from jax.experimental import pallas as pl
from jax.experimental.pallas import tpu as pltpu

LANES = 128
SUBLANES = 8
GRANULE = SUBLANES * LANES  # 1024 elements == one (8,128) f32 vreg


def _num_tensorcores():
    """Best-effort query of TensorCores per device (2 on v7x, 1 on v5e/v6e)."""
    try:
        info = pltpu.get_tpu_info()
    except Exception:
        return 1
    for attr in ("num_cores", "core_count", "num_tensorcores",
                 "tensorcores_per_chip", "cores_per_chip"):
        v = getattr(info, attr, None)
        if isinstance(v, int) and v >= 1:
            return int(v)
    return 1


def _pick_block_rows(rows, target, ncores):
    """Pick a block height (multiple of 8) near `target`.

    Prefer one that divides `rows` evenly and yields a tile count divisible by
    `ncores`, so the in-kernel row mask is compiled out entirely.  Only fall
    back to a ragged (masked) split when no reasonably large divisor exists.
    """
    target = min(target, rows)
    target = max(SUBLANES, (target // SUBLANES) * SUBLANES)
    floor = max(SUBLANES, target // 4)
    for br in range(target, floor - 1, -SUBLANES):
        if rows % br == 0 and (rows // br) % ncores == 0:
            return br
    for br in range(target, floor - 1, -SUBLANES):
        if rows % br == 0:
            return br
    return target  # ragged tail; kernel masks the invalid rows


def _focal_kernel(pred_ref, gt_ref, loss_ref, npos_ref, *,
                  multi_core, block_rows, tiles_per_core, valid_rows,
                  needs_mask):
    if multi_core:
        c = pl.program_id(0)   # TensorCore axis (core_parallel)
        i = pl.program_id(1)   # tile scan within a core (arbitrary)
    else:
        c = 0
        i = pl.program_id(0)

    # Init this core's resident (8,128) accumulators on its first step.
    @pl.when(i == 0)
    def _():
        loss_ref[...] = jnp.zeros_like(loss_ref)
        npos_ref[...] = jnp.zeros_like(npos_ref)

    pred = pred_ref[...].astype(jnp.float32)
    gt = gt_ref[...].astype(jnp.float32)

    if needs_mask:
        # Rows >= valid_rows are either garbage from a partial edge block or a
        # clamped duplicate tile of an uneven core split.  Replace them with
        # values that contribute exactly zero to loss and num_pos:
        # gt=2 kills both branches (pos_mask false, neg_f zero), pred=0.5
        # keeps log() finite.
        row0 = (c * tiles_per_core + i) * block_rows
        rid = row0 + jax.lax.broadcasted_iota(jnp.int32, pred.shape, 0)
        valid = rid < valid_rows
        pred = jnp.where(valid, pred, 0.5)
        gt = jnp.where(valid, gt, 2.0)

    pos_mask = gt == 1.0
    omp = 1.0 - pred
    d = 1.0 - gt
    d2 = d * d
    neg_w = d2 * d2                       # (1 - gt)^4 as explicit VPU multiplies

    # pos (gt==1) and neg (gt<1) branches are mutually exclusive -> one log/elem.
    l = jnp.log(jnp.where(pos_mask, pred, omp))
    if needs_mask:
        neg_f = (gt < 1.0).astype(jnp.float32)
        w = jnp.where(pos_mask, omp * omp, pred * pred * neg_w * neg_f)
    else:
        # Heatmap gt lies in [0, 1], so gt<1 is exactly the complement of
        # gt==1 and the explicit neg mask (compare + cast + mul) is dropped.
        w = jnp.where(pos_mask, omp * omp, pred * pred * neg_w)
    loss_elem = l * w                     # == pos_loss + neg_loss elementwise

    pos_f = pos_mask.astype(jnp.float32)

    # Lane-shaped partial accumulation: pure vreg adds, no per-step XLU reduce.
    loss_ref[...] += loss_elem.reshape(-1, SUBLANES, LANES).sum(axis=0)
    npos_ref[...] += pos_f.reshape(-1, SUBLANES, LANES).sum(axis=0)


def _focal_main_sums(p2, g2, rows, block_rows_target):
    """Run the streaming-reduction kernel over a (rows, 128) slab."""
    ncores = _num_tensorcores()
    core_parallel = getattr(pltpu, "CORE_PARALLEL", None)
    multi_core = (ncores > 1) and (core_parallel is not None)
    if not multi_core:
        ncores = 1

    block_rows = _pick_block_rows(rows, block_rows_target, ncores)
    n_tiles = pl.cdiv(rows, block_rows)
    tiles_per_core = pl.cdiv(n_tiles, ncores)
    needs_mask = (ncores * tiles_per_core * block_rows) != rows

    kernel = functools.partial(
        _focal_kernel,
        multi_core=multi_core,
        block_rows=block_rows,
        tiles_per_core=tiles_per_core,
        valid_rows=rows,
        needs_mask=needs_mask,
    )

    if multi_core:
        def in_map(c, i):
            # Clamp so overhanging logical tiles of an uneven core split read
            # an in-bounds block; the in-kernel row mask zeroes them out.
            return (jnp.minimum(c * tiles_per_core + i, n_tiles - 1), 0)

        grid = (ncores, tiles_per_core)
        in_specs = [pl.BlockSpec((block_rows, LANES), in_map),
                    pl.BlockSpec((block_rows, LANES), in_map)]
        out_specs = [
            pl.BlockSpec((None, SUBLANES, LANES), lambda c, i: (c, 0, 0)),
            pl.BlockSpec((None, SUBLANES, LANES), lambda c, i: (c, 0, 0)),
        ]
        out_shapes = (
            jax.ShapeDtypeStruct((ncores, SUBLANES, LANES), jnp.float32),
            jax.ShapeDtypeStruct((ncores, SUBLANES, LANES), jnp.float32),
        )
        dim_sem = (core_parallel, pltpu.ARBITRARY)
    else:
        grid = (n_tiles,)
        in_specs = [pl.BlockSpec((block_rows, LANES), lambda i: (i, 0)),
                    pl.BlockSpec((block_rows, LANES), lambda i: (i, 0))]
        out_specs = [
            pl.BlockSpec((SUBLANES, LANES), lambda i: (0, 0)),
            pl.BlockSpec((SUBLANES, LANES), lambda i: (0, 0)),
        ]
        out_shapes = (
            jax.ShapeDtypeStruct((SUBLANES, LANES), jnp.float32),
            jax.ShapeDtypeStruct((SUBLANES, LANES), jnp.float32),
        )
        dim_sem = ("arbitrary",)

    # Default block (4096 rows) needs ~8 MiB of input double-buffers -> fits
    # every chip's scoped-VMEM default; only set a limit for bigger requests.
    compiler_kwargs = dict(dimension_semantics=dim_sem)
    in_buf_bytes = 2 * 2 * block_rows * LANES * p2.dtype.itemsize + (2 << 20)
    if in_buf_bytes > (14 << 20):
        compiler_kwargs["vmem_limit_bytes"] = min(in_buf_bytes + (8 << 20),
                                                  48 << 20)

    loss_parts, npos_parts = pl.pallas_call(
        kernel,
        out_shape=out_shapes,
        grid_spec=pltpu.PrefetchScalarGridSpec(
            num_scalar_prefetch=0,
            grid=grid,
            in_specs=in_specs,
            out_specs=out_specs,
        ),
        compiler_params=pltpu.CompilerParams(**compiler_kwargs),
    )(p2, g2)

    return jnp.sum(loss_parts), jnp.sum(npos_parts)


def _tail_sums(pred_t, gt_t):
    """Plain-JAX contribution of the sub-1024-element ragged tail."""
    pred_t = pred_t.astype(jnp.float32)
    gt_t = gt_t.astype(jnp.float32)
    pos = gt_t == 1.0
    neg_f = (gt_t < 1.0).astype(jnp.float32)
    omp = 1.0 - pred_t
    d = 1.0 - gt_t
    neg_w = (d * d) * (d * d)
    l = jnp.log(jnp.where(pos, pred_t, omp))
    w = jnp.where(pos, omp * omp, pred_t * pred_t * neg_w * neg_f)
    return jnp.sum(l * w), jnp.sum(pos.astype(jnp.float32))


def focal_loss(pred, gt, block_rows=4096):
    """Pallas implementation of _neg_loss(pred, gt). pred, gt: (B, C, H, W)."""
    assert pred.shape == gt.shape
    n = pred.size

    flat_p = pred.reshape(-1)
    flat_g = gt.reshape(-1)

    # Kernel streams the (8*128)-aligned prefix (zero-copy reshape for typical
    # aligned heatmap shapes); any sub-1024-element remainder is handled in
    # plain JAX instead of padding/copying the whole array.
    n_main = (n // GRANULE) * GRANULE

    loss_sum = jnp.zeros((), jnp.float32)
    num_pos = jnp.zeros((), jnp.float32)

    if n_main > 0:
        if n_main == n:
            p_main, g_main = flat_p, flat_g
        else:
            p_main, g_main = flat_p[:n_main], flat_g[:n_main]
        rows = n_main // LANES                        # multiple of 8
        p2 = p_main.reshape(rows, LANES)
        g2 = g_main.reshape(rows, LANES)
        ls, npos = _focal_main_sums(p2, g2, rows, block_rows)
        loss_sum = loss_sum + ls
        num_pos = num_pos + npos

    if n_main < n:
        ls, npos = _tail_sums(flat_p[n_main:], flat_g[n_main:])
        loss_sum = loss_sum + ls
        num_pos = num_pos + npos

    # Final num_pos == 0 branch is scalar glue, done in plain JAX.
    # (num_pos == 0 implies pos_loss == 0, so -loss_sum == -neg_loss.)
    safe = jnp.where(num_pos == 0, 1.0, num_pos)
    return jnp.where(num_pos == 0, -loss_sum, -loss_sum / safe)


def _focal_loss_ref(pred, gt):
    pred = pred.astype(jnp.float32)
    gt = gt.astype(jnp.float32)
    pos_inds = (gt == 1.0).astype(jnp.float32)
    neg_inds = (gt < 1.0).astype(jnp.float32)
    neg_weights = (1.0 - gt) ** 4
    pos_loss = jnp.sum(jnp.log(pred) * (1.0 - pred) ** 2 * pos_inds)
    neg_loss = jnp.sum(jnp.log(1.0 - pred) * pred ** 2 * neg_weights * neg_inds)
    num_pos = jnp.sum(pos_inds)
    safe = jnp.where(num_pos == 0, 1.0, num_pos)
    return jnp.where(num_pos == 0, -neg_loss, -(pos_loss + neg_loss) / safe)


if __name__ == "__main__":
    key = jax.random.PRNGKey(0)
    k1, k2, k3, k4, k5, k6 = jax.random.split(key, 6)

    # Case 1: aligned NCHW shape with a few exact-1.0 peaks (clean kernel path,
    # no mask, no tail).
    B, C, H, W = 2, 4, 16, 16
    pred = jax.nn.sigmoid(jax.random.normal(k1, (B, C, H, W), dtype=jnp.float32))
    gt = jax.random.uniform(k2, (B, C, H, W), dtype=jnp.float32, maxval=0.9)
    gt = gt.at[0, 0, 4, 4].set(1.0)
    gt = gt.at[0, 2, 8, 3].set(1.0)
    gt = gt.at[1, 1, 10, 12].set(1.0)
    gt = gt.at[1, 3, 2, 7].set(1.0)

    out = jax.block_until_ready(focal_loss(pred, gt))
    ref = _focal_loss_ref(pred, gt)
    assert jnp.allclose(out, ref, rtol=1e-3, atol=1e-5), (out, ref)

    # Case 2: unaligned shape (2*4*13*17 = 1768 elems): kernel over the first
    # 1024 elements + plain-JAX tail, with positives in both regions.
    shape2 = (2, 4, 13, 17)
    n2 = 2 * 4 * 13 * 17
    pred2 = jax.nn.sigmoid(jax.random.normal(k3, shape2, dtype=jnp.float32))
    gt2_flat = jax.random.uniform(k4, (n2,), dtype=jnp.float32, maxval=0.9)
    gt2_flat = gt2_flat.at[100].set(1.0).at[1500].set(1.0)
    gt2 = gt2_flat.reshape(shape2)

    out2 = jax.block_until_ready(focal_loss(pred2, gt2))
    ref2 = _focal_loss_ref(pred2, gt2)
    assert jnp.allclose(out2, ref2, rtol=1e-3, atol=1e-5), (out2, ref2)

    # Case 3: aligned shape with no positives (num_pos == 0 branch).
    pred3 = jax.nn.sigmoid(jax.random.normal(k5, (1, 2, 16, 32), dtype=jnp.float32))
    gt3 = jax.random.uniform(k6, (1, 2, 16, 32), dtype=jnp.float32, maxval=0.9)

    out3 = jax.block_until_ready(focal_loss(pred3, gt3))
    ref3 = _focal_loss_ref(pred3, gt3)
    assert jnp.allclose(out3, ref3, rtol=1e-3, atol=1e-5), (out3, ref3)

    print("KERNEL_OK")
</pallas_src>

<mosaic_0001>
module attributes {stable_mosaic.version = 11 : i64} {
  func.func @_focal_kernel(%arg0: i32, %arg1: memref<16x128xf32, #tpu.memory_space<vmem>>, %arg2: memref<16x128xf32, #tpu.memory_space<vmem>>, %arg3: memref<8x128xf32, #tpu.memory_space<vmem>>, %arg4: memref<8x128xf32, #tpu.memory_space<vmem>>) attributes {dimension_semantics = [#tpu.dimension_semantics<arbitrary>], iteration_bounds = array<i64: 1>, scalar_prefetch = 0 : i64, scratch_operands = 0 : i64, tpu.core_type = #tpu.core_type<tc>, window_params = [{transform_indices = @transform_0, window_bounds = array<i64: 16, 128>}, {transform_indices = @transform_1, window_bounds = array<i64: 16, 128>}, {pipeline_mode = #tpu.pipeline_mode<synchronous>, transform_indices = @transform_2, window_bounds = array<i64: 8, 128>}, {pipeline_mode = #tpu.pipeline_mode<synchronous>, transform_indices = @transform_3, window_bounds = array<i64: 8, 128>}]} {
    %c0_i32 = arith.constant 0 : i32
    %0 = arith.cmpi eq, %arg0, %c0_i32 : i32
    %1 = arith.extui %0 : i1 to i32
    %c0_i32_0 = arith.constant 0 : i32
    %2 = arith.cmpi ne, %1, %c0_i32_0 : i32
    scf.if %2 {
      %cst_16 = arith.constant 0.000000e+00 : f32
      %32 = vector.broadcast %cst_16 : f32 to vector<8x128xf32>
      %c0_17 = arith.constant 0 : index
      %c0_18 = arith.constant 0 : index
      %33 = vector.load %arg3[%c0_17, %c0_18] : memref<8x128xf32, #tpu.memory_space<vmem>>, vector<8x128xf32>
      tpu.vector_store %arg3[%c0_17, %c0_18], %32 {strides = array<i32>} : memref<8x128xf32, #tpu.memory_space<vmem>>, vector<8x128xf32>,
      %cst_19 = arith.constant 0.000000e+00 : f32
      %34 = vector.broadcast %cst_19 : f32 to vector<8x128xf32>
      %c0_20 = arith.constant 0 : index
      %c0_21 = arith.constant 0 : index
      %35 = vector.load %arg4[%c0_20, %c0_21] : memref<8x128xf32, #tpu.memory_space<vmem>>, vector<8x128xf32>
      tpu.vector_store %arg4[%c0_20, %c0_21], %34 {strides = array<i32>} : memref<8x128xf32, #tpu.memory_space<vmem>>, vector<8x128xf32>,
    } else {
    }
    %c0 = arith.constant 0 : index
    %c0_1 = arith.constant 0 : index
    %3 = vector.load %arg1[%c0, %c0_1] : memref<16x128xf32, #tpu.memory_space<vmem>>, vector<16x128xf32>
    %c0_2 = arith.constant 0 : index
    %c0_3 = arith.constant 0 : index
    %4 = vector.load %arg2[%c0_2, %c0_3] : memref<16x128xf32, #tpu.memory_space<vmem>>, vector<16x128xf32>
    %cst = arith.constant 1.000000e+00 : f32
    %5 = vector.broadcast %cst : f32 to vector<16x128xf32>
    %6 = arith.cmpf oeq, %4, %5 : vector<16x128xf32>
    %cst_4 = arith.constant 1.000000e+00 : f32
    %7 = vector.broadcast %cst_4 : f32 to vector<16x128xf32>
    %8 = arith.subf %7, %3 : vector<16x128xf32>
    %cst_5 = arith.constant 1.000000e+00 : f32
    %9 = vector.broadcast %cst_5 : f32 to vector<16x128xf32>
    %10 = arith.subf %9, %4 : vector<16x128xf32>
    %11 = arith.mulf %10, %10 : vector<16x128xf32>
    %12 = arith.mulf %11, %11 : vector<16x128xf32>
    %13 = arith.select %6, %3, %8 : vector<16x128xi1>, vector<16x128xf32>
    %14 = math.log %13 : vector<16x128xf32>
    %15 = arith.mulf %8, %8 : vector<16x128xf32>
    %16 = arith.mulf %3, %3 : vector<16x128xf32>
    %17 = arith.mulf %16, %12 : vector<16x128xf32>
    %18 = arith.select %6, %15, %17 : vector<16x128xi1>, vector<16x128xf32>
    %19 = arith.mulf %14, %18 : vector<16x128xf32>
    %20 = arith.extui %6 : vector<16x128xi1> to vector<16x128xi32>
    %21 = arith.sitofp %20 : vector<16x128xi32> to vector<16x128xf32>
    %c0_6 = arith.constant 0 : index
    %c0_7 = arith.constant 0 : index
    %22 = vector.load %arg3[%c0_6, %c0_7] : memref<8x128xf32, #tpu.memory_space<vmem>>, vector<8x128xf32>
    %23 = vector.shape_cast %19 : vector<16x128xf32> to vector<2x8x128xf32>
    %cst_8 = arith.constant dense<0.000000e+00> : vector<8x128xf32>
    %24 = vector.multi_reduction <add>, %23, %cst_8 [0] : vector<2x8x128xf32> to vector<8x128xf32>
    %25 = arith.addf %22, %24 : vector<8x128xf32>
    %c0_9 = arith.constant 0 : index
    %c0_10 = arith.constant 0 : index
    %26 = vector.load %arg3[%c0_9, %c0_10] : memref<8x128xf32, #tpu.memory_space<vmem>>, vector<8x128xf32>
    tpu.vector_store %arg3[%c0_9, %c0_10], %25 {strides = array<i32>} : memref<8x128xf32, #tpu.memory_space<vmem>>, vector<8x128xf32>,
    %c0_11 = arith.constant 0 : index
    %c0_12 = arith.constant 0 : index
    %27 = vector.load %arg4[%c0_11, %c0_12] : memref<8x128xf32, #tpu.memory_space<vmem>>, vector<8x128xf32>
    %28 = vector.shape_cast %21 : vector<16x128xf32> to vector<2x8x128xf32>
    %cst_13 = arith.constant dense<0.000000e+00> : vector<8x128xf32>
    %29 = vector.multi_reduction <add>, %28, %cst_13 [0] : vector<2x8x128xf32> to vector<8x128xf32>
    %30 = arith.addf %27, %29 : vector<8x128xf32>
    %c0_14 = arith.constant 0 : index
    %c0_15 = arith.constant 0 : index
    %31 = vector.load %arg4[%c0_14, %c0_15] : memref<8x128xf32, #tpu.memory_space<vmem>>, vector<8x128xf32>
    tpu.vector_store %arg4[%c0_14, %c0_15], %30 {strides = array<i32>} : memref<8x128xf32, #tpu.memory_space<vmem>>, vector<8x128xf32>,
    return
  }
  func.func @transform_0(%arg0: i32) -> (i32, i32) {
    %c0_i32 = arith.constant 0 : i32
    %c0_i32_0 = arith.constant 0 : i32
    return %arg0, %c0_i32 : i32, i32
  }
  func.func @transform_1(%arg0: i32) -> (i32, i32) {
    %c0_i32 = arith.constant 0 : i32
    %c0_i32_0 = arith.constant 0 : i32
    return %arg0, %c0_i32 : i32, i32
  }
  func.func @transform_2(%arg0: i32) -> (i32, i32) {
    %c0_i32 = arith.constant 0 : i32
    %c0_i32_0 = arith.constant 0 : i32
    %c0_i32_1 = arith.constant 0 : i32
    return %c0_i32, %c0_i32_0 : i32, i32
  }
  func.func @transform_3(%arg0: i32) -> (i32, i32) {
    %c0_i32 = arith.constant 0 : i32
    %c0_i32_0 = arith.constant 0 : i32
    %c0_i32_1 = arith.constant 0 : i32
    return %c0_i32, %c0_i32_0 : i32, i32
  }
}

</mosaic_0001>

<bundles_post_ra>
// kernel: tpu_custom_call.1
= control target key start
LH: loop header
LB: loop body
LE: loop exit
PB: predicated region body
PF: predicated region fallthrough
CT: control target
= control target key end

     0   :  { %9 = vsyncpa [#allocation3], 0  ;;  %s291_s0 = inlined_call_operand.hbm [shape: f32[16,128], index: 0, kind: input, shape index: {}]   ;;  %s292_s1 = inlined_call_operand.hbm [shape: f32[16,128], index: 1, kind: input, shape index: {}]   ;;  %s293_s2 = inlined_call_operand.hbm [shape: f32[8,128], index: 2, kind: output, shape index: {0}]   ;;  %s294_s3 = inlined_call_operand.hbm [shape: f32[8,128], index: 3, kind: output, shape index: {1}]  }
   0x1   :  { %10 = vsyncpa [#allocation6], 0 }
   0x2   :  { %11 = vsyncpa [#allocation4], 0 }
   0x3   :  { %12 = vsyncpa [#allocation9], 0  ;;  %s17_s14 = sshll.u32 %s291_s0, 4  ;;  %s246_s15 = smov [#allocation2]   ;;  %s18_s14 = int_to_ptr.hbm [resolvable:$true] %s17_s14 }
   0x4   :  { %s19_s16 = sshll.u32 %s246_s15, 4  ;;  %s30_s19 = sshll.u32 %s292_s1, 4  ;;  %s20_s16 = int_to_ptr.vmem [resolvable:$true] %s19_s16  ;;  %s31_s19 = int_to_ptr.hbm [resolvable:$true] %s30_s19 }
   0x5   :  { %s247_s20 = smov 128   ;;  %s248_s21 = smov 8  }
   0x6   :  { %25 = dma.hbm_to_vmem [thread:$0]  %s18_s14, 256, %s20_s16, [#allocation3], %s247_s20, %s247_s20, %s248_s21  }
   0x7   :  { %s249_s22 = smov [#allocation5]  }
   0x8   :  { %s32_s23 = sshll.u32 %s249_s22, 4  ;;  %s33_s23 = int_to_ptr.vmem [resolvable:$true] %s32_s23 }
   0x9   :  { %38 = dma.hbm_to_vmem [thread:$0]  %s31_s19, 256, %s33_s23, [#allocation6], %s247_s20, %s247_s20, %s248_s21  }
   0xa   :  { %238 = dma.done.wait [#allocation3], 256  }
   0xb   :  { %239 = vsyncadd [#allocation3], 4294967040 }
   0xc   :  { %240 = dma.done.wait [#allocation6], 256  }
   0xd   :  { %241 = vsyncadd [#allocation6], 4294967040  ;;  %v53_v0 = vld [vmem:[#allocation2] sm:$0xff]  ;;  %v54_v1 = vld [vmem:[#allocation2 + $0x8] sm:$0xff]  ;;  %v250_v14 = vmov 0.0   ;;  %s251_s0 = smov [#allocation8]  }
   0xe   :  { %v55_v2 = vld [vmem:[#allocation5] sm:$0xff]  ;;  %v56_v3 = vld [vmem:[#allocation5 + $0x8] sm:$0xff]  ;;  %v59_v4 = vsub.f32 1.0, %v53_v0  ;;  %v60_v5 = vsub.f32 1.0, %v54_v1  ;;  %v75_v11 = vmul.f32 %v53_v0, %v53_v0  ;;  %v76_v13 = vmul.f32 %v54_v1, %v54_v1  ;;  %s111_s1 = sshll.u32 %s251_s0, 4  ;;  %s113_s26 = sshll.u32 %s294_s3, 4  ;;  %s112_s1 = int_to_ptr.vmem [resolvable:$true] %s111_s1  ;;  %s114_s26 = int_to_ptr.hbm [resolvable:$true] %s113_s26 }
   0xf   :  { %vm57_vm0 = vcmp.eq.f32.partialorder %v55_v2, 1.0  ;;  %v61_v6 = vsub.f32 1.0, %v55_v2  ;;  %vm58_vm1 = vcmp.eq.f32.partialorder %v56_v3, 1.0  ;;  %v62_v7 = vsub.f32 1.0, %v56_v3  ;;  %s252_s3 = smov [#allocation7]   ;;  %s102_s30 = sshll.u32 %s293_s2, 4  ;;  %s103_s30 = int_to_ptr.hbm [resolvable:$true] %s102_s30 }
  0x10   :  { %v67_v9 = vsel %vm57_vm0, %v53_v0, %v59_v4  ;;  %v68_v10 = vsel %vm58_vm1, %v54_v1, %v60_v5  ;;  %v129_v15 = vsel %vm57_vm0, 1.0, %v250_v14  ;;  %v130_v17 = vsel %vm58_vm1, 1.0, %v250_v14  ;;  %s100_s27 = sshll.u32 %s252_s3, 4  ;;  %s101_s27 = int_to_ptr.vmem [resolvable:$true] %s100_s27 }
  0x11   :  { %v63_v8 = vmul.f32 %v61_v6, %v61_v6  ;;  %v64_v12 = vmul.f32 %v62_v7, %v62_v7  ;;  %138 = vlog2.f32 %v67_v9  ;;  %v73_v19 = vmul.f32 %v59_v4, %v59_v4 }
  0x12   :  { %140 = vlog2.f32 %v68_v10  ;;  %v92_v20 = vadd.f32 %v130_v17, %v129_v15  ;;  %v74_v21 = vmul.f32 %v60_v5, %v60_v5 }
  0x13   :  { %v65_v16 = vmul.f32 %v63_v8, %v63_v8  ;;  %v66_v18 = vmul.f32 %v64_v12, %v64_v12 }
  0x14   :  { %94 = vst [vmem:[#allocation8] sm:$0xff] %v92_v20 }
  0x15   :  { %v77_v22 = vmul.f32 %v75_v11, %v65_v16  ;;  %v78_v23 = vmul.f32 %v76_v13, %v66_v18  ;;  %116 = dma.vmem_to_hbm [thread:$0]  %s112_s1, 128, %s114_s26, [#allocation9]  }
  0x17   :  { %v139_v24 = vpop.eup %138  ;;  %v79_v25 = vsel %vm57_vm0, %v73_v19, %v77_v22  ;;  %v80_v28 = vsel %vm58_vm1, %v74_v21, %v78_v23 }
  0x18   :  { %v141_v26 = vpop.eup %140  ;;  %v70_v27 = vmul.f32 0.6931472, %v139_v24 }
  0x19   :  { %v72_v29 = vmul.f32 0.6931472, %v141_v26 }
  0x1a   :  { %v81_v30 = vmul.f32 %v79_v25, %v70_v27 }
  0x1b   :  { %v82_v31 = vmul.f32 %v80_v28, %v72_v29 }
  0x1d   :  { %v88_v32 = vadd.f32 %v82_v31, %v81_v30 }
  0x1f   :  { %90 = vst [vmem:[#allocation7] sm:$0xff] %v88_v32 }
  0x20   :  { %105 = dma.vmem_to_hbm [thread:$0]  %s101_s27, 128, %s103_s30, [#allocation4]  }
  0x21   :  { %242 = dma.done.wait [#allocation4], 128  }
  0x22   :  { %243 = vsyncadd [#allocation4], 4294967168 }
  0x23   :  { %244 = dma.done.wait [#allocation9], 128  }
  0x24   :  { %245 = vsyncadd [#allocation9], 4294967168 }
  0x25   :  { %125 = vsyncpa [#allocation3], 1 }
  0x26   :  { %126 = vsyncpa [#allocation6], 1 }
  0x27   :  { %127 = vsyncpa [#allocation4], 1 }
  0x28   :  { %128 = vsyncpa [#allocation9], 1 }

</bundles_post_ra>
